<compile_context>
chip_gen: v5e
topology: v5e:2x2
jax: 0.10.0
libtpu: 0.0.40
codegen_flags: <defaults>
</compile_context>

<pallas_src>
import functools

import jax
import jax.numpy as jnp
from jax.experimental import pallas as pl
from jax.experimental.pallas import tpu as pltpu


def _round_up(v, m):
    return ((v + m - 1) // m) * m


def _vime_kernel(x_ref, wh_ref, bh_ref, wheads_ref, bheads_ref, out_ref):
    """One batch tile: h = relu(x@Wh + bh); out = sigmoid(h @ [Wm|Wf] + [bm|bf])."""
    x = x_ref[...]

    # Hidden projection (MXU, f32 accumulation) + bias + ReLU in f32.
    h = jnp.dot(x, wh_ref[...], preferred_element_type=jnp.float32) + bh_ref[...]
    h = jnp.maximum(h, 0.0)

    # Fused mask|feature heads: one lane-dense (block_b, 2*Dp) matmul + sigmoid.
    z = jnp.dot(h.astype(wheads_ref.dtype), wheads_ref[...],
                preferred_element_type=jnp.float32) + bheads_ref[...]
    out_ref[...] = jax.nn.sigmoid(z).astype(out_ref.dtype)


@functools.partial(jax.jit, static_argnames=("block_b", "compute_dtype"))
def vime_self_forward(x, wh, bh, wm, bm, wf, bf, *, block_b=None,
                      compute_dtype=jnp.bfloat16):
    """Pallas VIME self-supervised forward.

    Args:
      x:  (B, D) input batch.
      wh, wm, wf: (D, D) weights, pre-transposed to (in, out) layout.
      bh, bm, bf: (D,) or (1, D) biases.
      block_b: batch tile (rows per grid step); auto-picked if None.
      compute_dtype: MXU operand dtype (bf16 default; jnp.float32 for
        bit-closer-to-PyTorch results).

    Returns:
      (mask, feature): two (B, D) arrays with the dtype of x.
    """
    B, D = x.shape
    out_dtype = x.dtype

    # Lane-dense padding of the feature dim to a multiple of 128.
    Dp = _round_up(D, 128)
    Dh2 = 2 * Dp  # fused mask|feature output width

    # Batch tile: multiple of 16 (bf16 sublane packing; also covers f32's 8),
    # <= 512, and small enough that the grid has >= 2 steps when B allows
    # (v7x megacore sharding of the "parallel" axis).
    if block_b is None:
        block_b = max(16, min(512, _round_up(-(-B // 2), 16)))
    else:
        block_b = max(16, _round_up(int(block_b), 16))
    Bp = _round_up(B, block_b)
    grid = (Bp // block_b,)

    cdt = jnp.dtype(compute_dtype)

    # ---- Pad / repack parameters (zero padding keeps the math exact). ----
    xp = jnp.zeros((Bp, Dp), cdt).at[:B, :D].set(x.astype(cdt))
    whp = jnp.zeros((Dp, Dp), cdt).at[:D, :D].set(wh.astype(cdt))
    bhp = jnp.zeros((1, Dp), jnp.float32).at[:, :D].set(
        bh.reshape(1, -1).astype(jnp.float32))

    w_heads = jnp.zeros((Dp, Dh2), cdt)
    w_heads = w_heads.at[:D, :D].set(wm.astype(cdt))
    w_heads = w_heads.at[:D, Dp:Dp + D].set(wf.astype(cdt))
    b_heads = jnp.zeros((1, Dh2), jnp.float32)
    b_heads = b_heads.at[:, :D].set(bm.reshape(1, -1).astype(jnp.float32))
    b_heads = b_heads.at[:, Dp:Dp + D].set(bf.reshape(1, -1).astype(jnp.float32))

    # ---- Block specs: x / output tiled over batch; params replicated
    # (constant index_map => DMA'd once, stay resident across the grid). ----
    x_spec = pl.BlockSpec((block_b, Dp), lambda i: (i, 0))
    wh_spec = pl.BlockSpec((Dp, Dp), lambda i: (0, 0))
    bh_spec = pl.BlockSpec((1, Dp), lambda i: (0, 0))
    wheads_spec = pl.BlockSpec((Dp, Dh2), lambda i: (0, 0))
    bheads_spec = pl.BlockSpec((1, Dh2), lambda i: (0, 0))
    out_spec = pl.BlockSpec((block_b, Dh2), lambda i: (i, 0))

    # Cost hint for XLA's scheduler.
    itemsize = cdt.itemsize
    out_itemsize = jnp.dtype(out_dtype).itemsize
    io_bytes = (Bp * Dp * itemsize + Dp * Dp * itemsize + Dp * Dh2 * itemsize
                + (Dp + Dh2) * 4 + Bp * Dh2 * out_itemsize)
    cost = pl.CostEstimate(
        flops=2 * Bp * Dp * Dp + 2 * Bp * Dp * Dh2,
        transcendentals=Bp * Dh2,
        bytes_accessed=io_bytes,
    )

    # VMEM budget: the auto-pipeline double-buffers every block.
    vmem_est = 2 * (block_b * Dp * itemsize + Dp * Dp * itemsize
                    + Dp * Dh2 * itemsize + (Dp + Dh2) * 4
                    + block_b * Dh2 * out_itemsize)
    compiler_kwargs = dict(dimension_semantics=("parallel",))
    if vmem_est > 16 * 1024 * 1024:
        compiler_kwargs["vmem_limit_bytes"] = int(
            min(int(vmem_est * 1.5), 100 * 1024 * 1024))

    out = pl.pallas_call(
        _vime_kernel,
        out_shape=jax.ShapeDtypeStruct((Bp, Dh2), out_dtype),
        grid_spec=pltpu.PrefetchScalarGridSpec(
            num_scalar_prefetch=0,
            grid=grid,
            in_specs=[x_spec, wh_spec, bh_spec, wheads_spec, bheads_spec],
            out_specs=out_spec,
        ),
        compiler_params=pltpu.CompilerParams(**compiler_kwargs),
        cost_estimate=cost,
    )(xp, whp, bhp, w_heads, b_heads)

    mask = out[:B, :D]
    feature = out[:B, Dp:Dp + D]
    return mask, feature


def _init_linear(key, in_dim, out_dim):
    """nn.Linear-style init; weight returned pre-transposed to (in, out)."""
    kw, kb = jax.random.split(key)
    bound = 1.0 / (in_dim ** 0.5)
    w = jax.random.uniform(kw, (in_dim, out_dim), jnp.float32, -bound, bound)
    b = jax.random.uniform(kb, (out_dim,), jnp.float32, -bound, bound)
    return w, b


def _reference(x, wh, bh, wm, bm, wf, bf):
    h = jax.nn.relu(x @ wh + bh)
    return jax.nn.sigmoid(h @ wm + bm), jax.nn.sigmoid(h @ wf + bf)


if __name__ == "__main__":
    key = jax.random.PRNGKey(0)
    k_x, k_h, k_m, k_f = jax.random.split(key, 4)

    # input_dim = 32 (hidden_dim is unused by the module's forward pass);
    # batch = 128 so the padded grid has 2 steps (exercises the megacore path).
    B, D = 128, 32

    x = jax.random.normal(k_x, (B, D), jnp.float32)
    wh, bh = _init_linear(k_h, D, D)
    wm, bm = _init_linear(k_m, D, D)
    wf, bf = _init_linear(k_f, D, D)

    ref_mask, ref_feature = _reference(x, wh, bh, wm, bm, wf, bf)

    # bf16 MXU operands (default fast path) -> loosened tolerance.
    mask, feature = vime_self_forward(x, wh, bh, wm, bm, wf, bf)
    jax.block_until_ready((mask, feature))
    assert mask.shape == (B, D) and feature.shape == (B, D)
    assert jnp.allclose(mask, ref_mask, atol=2e-2, rtol=2e-2)
    assert jnp.allclose(feature, ref_feature, atol=2e-2, rtol=2e-2)

    # Pure-f32 path matches the reference tightly.
    mask32, feature32 = vime_self_forward(
        x, wh, bh, wm, bm, wf, bf, compute_dtype=jnp.float32)
    jax.block_until_ready((mask32, feature32))
    assert jnp.allclose(mask32, ref_mask, atol=1e-4, rtol=1e-4)
    assert jnp.allclose(feature32, ref_feature, atol=1e-4, rtol=1e-4)

    print("KERNEL_OK")
</pallas_src>

<mosaic_0001>
module attributes {stable_mosaic.version = 11 : i64} {
  func.func @_vime_kernel(%arg0: i32, %arg1: memref<64x128xbf16, #tpu.memory_space<vmem>>, %arg2: memref<128x128xbf16, #tpu.memory_space<vmem>>, %arg3: memref<1x128xf32, #tpu.memory_space<vmem>>, %arg4: memref<128x256xbf16, #tpu.memory_space<vmem>>, %arg5: memref<1x256xf32, #tpu.memory_space<vmem>>, %arg6: memref<64x256xf32, #tpu.memory_space<vmem>>) attributes {dimension_semantics = [#tpu.dimension_semantics<parallel>], iteration_bounds = array<i64: 2>, scalar_prefetch = 0 : i64, scratch_operands = 0 : i64, tpu.core_type = #tpu.core_type<tc>, window_params = [{transform_indices = @transform_0, window_bounds = array<i64: 64, 128>}, {pipeline_mode = #tpu.pipeline_mode<synchronous>, transform_indices = @transform_1, window_bounds = array<i64: 128, 128>}, {pipeline_mode = #tpu.pipeline_mode<synchronous>, transform_indices = @transform_2, window_bounds = array<i64: 1, 128>}, {pipeline_mode = #tpu.pipeline_mode<synchronous>, transform_indices = @transform_3, window_bounds = array<i64: 128, 256>}, {pipeline_mode = #tpu.pipeline_mode<synchronous>, transform_indices = @transform_4, window_bounds = array<i64: 1, 256>}, {transform_indices = @transform_5, window_bounds = array<i64: 64, 256>}]} {
    %c0 = arith.constant 0 : index
    %c0_0 = arith.constant 0 : index
    %0 = vector.load %arg1[%c0, %c0_0] : memref<64x128xbf16, #tpu.memory_space<vmem>>, vector<64x128xbf16>
    %c0_1 = arith.constant 0 : index
    %c0_2 = arith.constant 0 : index
    %1 = vector.load %arg2[%c0_1, %c0_2] : memref<128x128xbf16, #tpu.memory_space<vmem>>, vector<128x128xbf16>
    %cst = arith.constant dense<0.000000e+00> : vector<64x128xf32>
    %2 = tpu.matmul %0, %1, %cst {dimension_numbers = #tpu.dot_dimension_numbers<[1], [0], [0], [1], [0, 0, 1, 1], [], []>} : vector<64x128xbf16>, vector<128x128xbf16>, vector<64x128xf32> -> vector<64x128xf32>
    %c0_3 = arith.constant 0 : index
    %c0_4 = arith.constant 0 : index
    %3 = vector.load %arg3[%c0_3, %c0_4] : memref<1x128xf32, #tpu.memory_space<vmem>>, vector<1x128xf32>
    %4 = vector.broadcast %3 : vector<1x128xf32> to vector<64x128xf32>
    %5 = arith.addf %2, %4 : vector<64x128xf32>
    %cst_5 = arith.constant 0.000000e+00 : f32
    %6 = vector.broadcast %cst_5 : f32 to vector<64x128xf32>
    %7 = arith.maximumf %5, %6 : vector<64x128xf32>
    %8 = arith.truncf %7 : vector<64x128xf32> to vector<64x128xbf16>
    %c0_6 = arith.constant 0 : index
    %c0_7 = arith.constant 0 : index
    %9 = vector.load %arg4[%c0_6, %c0_7] : memref<128x256xbf16, #tpu.memory_space<vmem>>, vector<128x256xbf16>
    %cst_8 = arith.constant dense<0.000000e+00> : vector<64x256xf32>
    %10 = tpu.matmul %8, %9, %cst_8 {dimension_numbers = #tpu.dot_dimension_numbers<[1], [0], [0], [1], [0, 0, 1, 1], [], []>} : vector<64x128xbf16>, vector<128x256xbf16>, vector<64x256xf32> -> vector<64x256xf32>
    %c0_9 = arith.constant 0 : index
    %c0_10 = arith.constant 0 : index
    %11 = vector.load %arg5[%c0_9, %c0_10] : memref<1x256xf32, #tpu.memory_space<vmem>>, vector<1x256xf32>
    %12 = vector.broadcast %11 : vector<1x256xf32> to vector<64x256xf32>
    %13 = arith.addf %10, %12 : vector<64x256xf32>
    %14 = arith.negf %13 : vector<64x256xf32>
    %15 = math.exp %14 : vector<64x256xf32>
    %cst_11 = arith.constant 1.000000e+00 : f32
    %16 = vector.broadcast %cst_11 : f32 to vector<64x256xf32>
    %17 = arith.addf %16, %15 : vector<64x256xf32>
    %18 = arith.divf %16, %17 : vector<64x256xf32>
    %c0_12 = arith.constant 0 : index
    %c0_13 = arith.constant 0 : index
    %19 = vector.load %arg6[%c0_12, %c0_13] : memref<64x256xf32, #tpu.memory_space<vmem>>, vector<64x256xf32>
    tpu.vector_store %arg6[%c0_12, %c0_13], %18 {strides = array<i32>} : memref<64x256xf32, #tpu.memory_space<vmem>>, vector<64x256xf32>,
    return
  }
  func.func @transform_0(%arg0: i32) -> (i32, i32) {
    %c0_i32 = arith.constant 0 : i32
    %c0_i32_0 = arith.constant 0 : i32
    return %arg0, %c0_i32 : i32, i32
  }
  func.func @transform_1(%arg0: i32) -> (i32, i32) {
    %c0_i32 = arith.constant 0 : i32
    %c0_i32_0 = arith.constant 0 : i32
    %c0_i32_1 = arith.constant 0 : i32
    return %c0_i32, %c0_i32_0 : i32, i32
  }
  func.func @transform_2(%arg0: i32) -> (i32, i32) {
    %c0_i32 = arith.constant 0 : i32
    %c0_i32_0 = arith.constant 0 : i32
    %c0_i32_1 = arith.constant 0 : i32
    return %c0_i32, %c0_i32_0 : i32, i32
  }
  func.func @transform_3(%arg0: i32) -> (i32, i32) {
    %c0_i32 = arith.constant 0 : i32
    %c0_i32_0 = arith.constant 0 : i32
    %c0_i32_1 = arith.constant 0 : i32
    return %c0_i32, %c0_i32_0 : i32, i32
  }
  func.func @transform_4(%arg0: i32) -> (i32, i32) {
    %c0_i32 = arith.constant 0 : i32
    %c0_i32_0 = arith.constant 0 : i32
    %c0_i32_1 = arith.constant 0 : i32
    return %c0_i32, %c0_i32_0 : i32, i32
  }
  func.func @transform_5(%arg0: i32) -> (i32, i32) {
    %c0_i32 = arith.constant 0 : i32
    %c0_i32_0 = arith.constant 0 : i32
    return %arg0, %c0_i32 : i32, i32
  }
}

</mosaic_0001>

<bundles_post_ra>
// kernel: vime_self_forward.1
= control target key start
LH: loop header
LB: loop body
LE: loop exit
PB: predicated region body
PF: predicated region fallthrough
CT: control target
= control target key end

     0   :  { %s1197_s18 = smov 0   ;;  %s1494_s0 = inlined_call_operand.vmem [shape: bf16[128,128], index: 0, kind: input, shape index: {}]   ;;  %s1495_s1 = inlined_call_operand.vmem [shape: bf16[128,128], index: 1, kind: input, shape index: {}]   ;;  %s1496_s2 = inlined_call_operand.vmem [shape: f32[1,128], index: 2, kind: input, shape index: {}]   ;;  %s1497_s3 = inlined_call_operand.vmem [shape: bf16[128,256], index: 3, kind: input, shape index: {}]   ;;  %s1498_s4 = inlined_call_operand.vmem [shape: f32[1,256], index: 4, kind: input, shape index: {}]   ;;  %s1499_s5 = inlined_call_operand.vmem [shape: f32[128,256], index: 5, kind: output, shape index: {}]  }
   0x1 LB: > { %s909_s19 = sadd.s32 4294967295, %s1165_s18   ;;  %p913_p0 = scmp.ge.s32.totalorder %s1165_s18, 1  ;;  %s1165_s18 = sphi %s1197_s18, %s15_s18  }
   0x2   : > { %p188_p1 = scmp.lt.s32.totalorder %s1165_s18, 3 }
   0x4   : > { %p189_p2 = pnand %p913_p0, %p188_p1 }
   0x5   : > { %s914_s28 = sshll.u32 (!%p189_p2), %s909_s19, 3 }
   0x6   : > { %192 = sbr.rel (%p189_p2) target bundleno = 404 (0x194), region = 40  ;;  %p218_p3 = scmp.lt.s32.totalorder (!%p189_p2), %s914_s28, 15 }
   0xb   : > { %v1061_v0 = vld [vmem:[%s1495_s1 + $0x38] sm:$0xff]  ;;  %v1060_v1 = vld [vmem:[%s1495_s1 + $0x30] sm:$0xff]  ;;  %v1059_v2 = vld [vmem:[%s1495_s1 + $0x28] sm:$0xff]  ;;  %s1507_s28 = smov (!%p218_p3, %s914_s28), 15 }
   0xc   : > { %330 = vmatpush.bf16.msra.mxu0 %v1061_v0  ;;  %1078 = vmatpush.bf16.msra.mxu3 %v1061_v0  ;;  %v1058_v3 = vld [vmem:[%s1495_s1 + $0x20] sm:$0xff]  ;;  %v1057_v4 = vld [vmem:[%s1495_s1 + $0x18] sm:$0xff]  ;;  %v1056_v5 = vld [vmem:[%s1495_s1 + $0x10] sm:$0xff]  ;;  %s915_s10 = sshll.u32 %s1507_s28, 2  ;;  %s1049_s16 = sshll.u32 %s1507_s28, 4 }
   0xd   : > { %v1055_v6 = vld [vmem:[%s1495_s1 + $0x8] sm:$0xff]  ;;  %v1054_v7 = vld [vmem:[%s1495_s1] sm:$0xff]  ;;  %s1235_s15 = scalar_lea.vmem %s1494_s0, %s915_s10  ;;  %v1025_v10 = vld [vmem:[%s1497_s3 + $0x70] sm:$0xf]  ;;  %s1363_s20 = scalar_lea.vmem %s1499_s5, %s1049_s16 }
   0xe   : > { %v1050_v8 = vld [vmem:[%s1235_s15] sm:$0xff]  ;;  %v1051_v9 = vld [vmem:[%s1235_s15 + $0x8] sm:$0xff]  ;;  %v1077_v11 = vld [vmem:[%s1497_s3 + $0x74] sm:$0xf0] }
   0xf   : > { %v1076_v12 = vld [vmem:[%s1497_s3 + $0x74] sm:$0xf]  ;;  %v1026_v13 = vor.u32 %v1077_v11, %v1025_v10  ;;  %v1027_v14 = vld [vmem:[%s1497_s3 + $0x78] sm:$0xf0]  ;;  %v1017_v15 = vld [vmem:[%s1497_s3 + $0x60] sm:$0xf] }
  0x10   : > { %331 = vmatpush.bf16.msra.mxu0 %v1060_v1  ;;  %1079 = vmatpush.bf16.msra.mxu3 %v1060_v1  ;;  %v1075_v16 = vld [vmem:[%s1497_s3 + $0x64] sm:$0xf0]  ;;  %v1030_v17 = vor.u32 %v1076_v12, %v1027_v14  ;;  %v1074_v18 = vld [vmem:[%s1497_s3 + $0x64] sm:$0xf]  ;;  %v1019_v19 = vld [vmem:[%s1497_s3 + $0x68] sm:$0xf0] }
  0x11   : > { %473 = vmatpush.bf16.msra.mxu1 %v1026_v13  ;;  %v1018_v20 = vor.u32 %v1075_v16, %v1017_v15  ;;  %v1022_v21 = vor.u32 %v1074_v18, %v1019_v19  ;;  %v1009_v22 = vld [vmem:[%s1497_s3 + $0x50] sm:$0xf]  ;;  %v1073_v23 = vld [vmem:[%s1497_s3 + $0x54] sm:$0xf0]  ;;  %v1072_v24 = vld [vmem:[%s1497_s3 + $0x54] sm:$0xf] }
  0x12   : > { %502 = vmatpush.bf16.msra.mxu2 %v1030_v17  ;;  %v1011_v25 = vld [vmem:[%s1497_s3 + $0x58] sm:$0xf0]  ;;  %v1010_v26 = vor.u32 %v1073_v23, %v1009_v22  ;;  %v1001_v28 = vld [vmem:[%s1497_s3 + $0x40] sm:$0xf]  ;;  %v1071_v29 = vld [vmem:[%s1497_s3 + $0x44] sm:$0xf0] }
  0x13   : > { %v1014_v27 = vor.u32 %v1072_v24, %v1011_v25  ;;  %v1070_v30 = vld [vmem:[%s1497_s3 + $0x44] sm:$0xf]  ;;  %v1003_v31 = vld [vmem:[%s1497_s3 + $0x48] sm:$0xf0]  ;;  %v1002_v32 = vor.u32 %v1071_v29, %v1001_v28  ;;  %v1052_v33 = vld [vmem:[%s1235_s15 + $0x10] sm:$0xff] }
  0x14   : > { %332 = vmatpush.bf16.msra.mxu0 %v1059_v2  ;;  %1080 = vmatpush.bf16.msra.mxu3 %v1059_v2  ;;  %v1006_v34 = vor.u32 %v1070_v30, %v1003_v31  ;;  %v1053_v35 = vld [vmem:[%s1235_s15 + $0x18] sm:$0xff]  ;;  %v993_v36 = vld [vmem:[%s1497_s3 + $0x30] sm:$0xf]  ;;  %v1068_v38 = vld [vmem:[%s1497_s3 + $0x34] sm:$0xf] }
  0x15   : > { %474 = vmatpush.bf16.msra.mxu1 %v1018_v20  ;;  %v1069_v37 = vld [vmem:[%s1497_s3 + $0x34] sm:$0xf0]  ;;  %v995_v40 = vld [vmem:[%s1497_s3 + $0x38] sm:$0xf0]  ;;  %v985_v42 = vld [vmem:[%s1497_s3 + $0x20] sm:$0xf] }
  0x16   : > { %503 = vmatpush.bf16.msra.mxu2 %v1022_v21  ;;  %v994_v39 = vor.u32 %v1069_v37, %v993_v36  ;;  %v998_v41 = vor.u32 %v1068_v38, %v995_v40  ;;  %v1067_v43 = vld [vmem:[%s1497_s3 + $0x24] sm:$0xf0]  ;;  %v1066_v44 = vld [vmem:[%s1497_s3 + $0x24] sm:$0xf]  ;;  %v987_v46 = vld [vmem:[%s1497_s3 + $0x28] sm:$0xf0] }
  0x17   : > { %v986_v45 = vor.u32 %v1067_v43, %v985_v42  ;;  %v990_v47 = vor.u32 %v1066_v44, %v987_v46  ;;  %v977_v48 = vld [vmem:[%s1497_s3 + $0x10] sm:$0xf]  ;;  %v1065_v49 = vld [vmem:[%s1497_s3 + $0x14] sm:$0xf0]  ;;  %v1064_v50 = vld [vmem:[%s1497_s3 + $0x14] sm:$0xf] }
  0x18   : > { %333 = vmatpush.bf16.msra.mxu0 %v1058_v3  ;;  %1081 = vmatpush.bf16.msra.mxu3 %v1058_v3  ;;  %v978_v51 = vor.u32 %v1065_v49, %v977_v48  ;;  %v979_v52 = vld [vmem:[%s1497_s3 + $0x18] sm:$0xf0]  ;;  %v969_v54 = vld [vmem:[%s1497_s3] sm:$0xf]  ;;  %v1063_v55 = vld [vmem:[%s1497_s3 + $0x4] sm:$0xf0] }
  0x19   : > { %475 = vmatpush.bf16.msra.mxu1 %v1010_v26  ;;  %v982_v53 = vor.u32 %v1064_v50, %v979_v52  ;;  %v1062_v56 = vld [vmem:[%s1497_s3 + $0x4] sm:$0xf]  ;;  %v970_v57 = vor.u32 %v1063_v55, %v969_v54  ;;  %v971_v58 = vld [vmem:[%s1497_s3 + $0x8] sm:$0xf0]  ;;  %v1094_v61 = vld [vmem:[%s1496_s2] ss:$0 sm:$0xff] }
  0x1a   : > { %504 = vmatpush.bf16.msra.mxu2 %v1014_v27  ;;  %v974_v59 = vor.u32 %v1062_v56, %v971_v58  ;;  %v387_v25 = vld [vmem:[%s1498_s4] sm:$0x3] }
  0x1b   : > { %v1343_v26 = vperm.slane %v387_v25, 0  ;;  %v1346_v30 = vperm.slane %v387_v25, 1 }
  0x1c   : > { %334 = vmatpush.bf16.msra.mxu0 %v1057_v4  ;;  %1082 = vmatpush.bf16.msra.mxu3 %v1057_v4 }
  0x1d   : > { %476 = vmatpush.bf16.msra.mxu1 %v1002_v32 }
  0x1e   : > { %505 = vmatpush.bf16.msra.mxu2 %v1006_v34 }
  0x20   : > { %335 = vmatpush.bf16.msra.mxu0 %v1056_v5  ;;  %1083 = vmatpush.bf16.msra.mxu3 %v1056_v5 }
  0x21   : > { %477 = vmatpush.bf16.msra.mxu1 %v994_v39 }
  0x22   : > { %506 = vmatpush.bf16.msra.mxu2 %v998_v41 }
  0x24   : > { %336 = vmatpush.bf16.msra.mxu0 %v1055_v6  ;;  %1084 = vmatpush.bf16.msra.mxu3 %v1055_v6 }
  0x25   : > { %478 = vmatpush.bf16.msra.mxu1 %v986_v45 }
  0x26   : > { %507 = vmatpush.bf16.msra.mxu2 %v990_v47 }
  0x28   : > { %337 = vmatpush.bf16.msra.mxu0 %v1054_v7  ;;  %1085 = vmatpush.bf16.msra.mxu3 %v1054_v7 }
  0x29   : > { %479 = vmatpush.bf16.msra.mxu1 %v978_v51 }
  0x2a   : > { %508 = vmatpush.bf16.msra.mxu2 %v982_v53 }
  0x2b   : > { %338 = vmatmul.bf16.vlgmr.msra.gmra.mxu0 %v1050_v8  ;;  %343 = vmatmul.bf16.vlgmr.msra.gmra.mxu3 %v1051_v9 }
  0x2d   : > { %480 = vmatpush.bf16.msra.mxu1 %v970_v57 }
  0x2e   : > { %509 = vmatpush.bf16.msra.mxu2 %v974_v59 }
  0x3b   : > { %348 = vmatmul.bf16.gmra.mxu3 %v1052_v33 }
  0x4b   : > { %353 = vmatmul.bf16.gmra.mxu3 %v1053_v35 }
  0xa8   : > { %v339_v60 = vpop.f32.mrf.mxu0 }
  0xa9   : > { %v340_v63 = vadd.f32 %v1094_v61, %v339_v60 }
  0xab   : > { %v359_v2 = vmax.f32 %v340_v63, 0.0 }
  0xae   : > { %v344_v62 = vpop.f32.mrf.mxu3 }
  0xaf   : > { %v345_v6 = vadd.f32 %v1094_v61, %v344_v62 }
  0xb0   : > { %v341_v0 = vpop.f32.mrf.mxu0 }
  0xb1   : > { %v342_v1 = vadd.f32 %v1094_v61, %v341_v0  ;;  %v361_v9 = vmax.f32 %v345_v6, 0.0 }
  0xb3   : > { %v360_v3 = vmax.f32 %v342_v1, 0.0 }
  0xb5   : > { %v367_v4 = vpack.c.bf16 %v360_v3, %v359_v2 }
  0xb6   : > { %v346_v5 = vpop.f32.mrf.mxu3 }
  0xb7   : > { %481 = vmatmul.bf16.vlgmr.msra.gmra.mxu1 %v367_v4  ;;  %510 = vmatmul.bf16.vlgmr.msra.gmra.mxu2 %v367_v4  ;;  %v347_v7 = vadd.f32 %v1094_v61, %v346_v5 }
  0xb9   : > { %v362_v10 = vmax.f32 %v347_v7, 0.0 }
  0xbb   : > { %v368_v11 = vpack.c.bf16 %v362_v10, %v361_v9 }
  0xbe   : > { %v349_v8 = vpop.f32.mrf.mxu3 }
  0xbf   : > { %v350_v13 = vadd.f32 %v1094_v61, %v349_v8 }
  0xc1   : > { %v363_v16 = vmax.f32 %v350_v13, 0.0 }
  0xc6   : > { %v351_v12 = vpop.f32.mrf.mxu3 }
  0xc7   : > { %486 = vmatmul.bf16.gmra.mxu1 %v368_v11  ;;  %515 = vmatmul.bf16.gmra.mxu2 %v368_v11  ;;  %v352_v14 = vadd.f32 %v1094_v61, %v351_v12 }
  0xc9   : > { %v364_v17 = vmax.f32 %v352_v14, 0.0 }
  0xcb   : > { %v369_v18 = vpack.c.bf16 %v364_v17, %v363_v16 }
  0xce   : > { %v354_v15 = vpop.f32.mrf.mxu3 }
  0xcf   : > { %v355_v20 = vadd.f32 %v1094_v61, %v354_v15 }
  0xd1   : > { %v365_v22 = vmax.f32 %v355_v20, 0.0 }
  0xd6   : > { %v356_v19 = vpop.f32.mrf.mxu3 }
  0xd7   : > { %491 = vmatmul.bf16.gmra.mxu1 %v369_v18  ;;  %520 = vmatmul.bf16.gmra.mxu2 %v369_v18  ;;  %v357_v21 = vadd.f32 %v1094_v61, %v356_v19 }
  0xd9   : > { %v366_v23 = vmax.f32 %v357_v21, 0.0 }
  0xdb   : > { %v370_v24 = vpack.c.bf16 %v366_v23, %v365_v22 }
  0xe7   : > { %496 = vmatmul.bf16.gmra.mxu1 %v370_v24  ;;  %525 = vmatmul.bf16.gmra.mxu2 %v370_v24 }
 0x134   : > { %v482_v27 = vpop.f32.mrf.mxu1 }
 0x135   : > { %v483_v28 = vadd.f32 %v482_v27, %v1343_v26 }
 0x137   : > { %v1031_v29 = vmul.f32 -1.442695, %v483_v28 }
 0x139   : > { %1095 = vpow2.f32 %v1031_v29 }
 0x13a   : > { %v511_v31 = vpop.f32.mrf.mxu2 }
 0x13b   : > { %v512_v32 = vadd.f32 %v511_v31, %v1346_v30 }
 0x13c   : > { %v484_v33 = vpop.f32.mrf.mxu1 }
 0x13d   : > { %v1032_v34 = vmul.f32 -1.442695, %v512_v32  ;;  %v485_v35 = vadd.f32 %v484_v33, %v1343_v26 }
 0x13f   : > { %v1096_v36 = vpop.eup %1095  ;;  %1097 = vpow2.f32 %v1032_v34  ;;  %v1033_v37 = vmul.f32 -1.442695, %v485_v35 }
 0x140   : > { %v579_v38 = vadd.f32 1.0, %v1096_v36 }
 0x141   : > { %1099 = vpow2.f32 %v1033_v37 }
 0x142   : > { %1101 = vrcp.f32 %v579_v38  ;;  %v513_v39 = vpop.f32.mrf.mxu2  ;;  %v604_v53 = vand.u32 2147483647, %v579_v38  ;;  %v606_v54 = vand.u32 2147483648, %v579_v38  ;;  %vm600_vm1 = vweird.f32 %v579_v38 }
 0x143   : > { %v514_v40 = vadd.f32 %v513_v39, %v1346_v30 }
 0x144   : > { %v487_v41 = vpop.f32.mrf.mxu1  ;;  %vm605_vm3 = vcmp.eq.f32.partialorder %v604_v53, 8.507059e+37  ;;  %v607_v2 = vor.u32 1.1754944e-38, %v606_v54 }
 0x145   : > { %v1098_v42 = vpop.eup %1097  ;;  %v1034_v43 = vmul.f32 -1.442695, %v514_v40  ;;  %v488_v44 = vadd.f32 %v487_v41, %v1343_v26 }
 0x146   : > { %v580_v45 = vadd.f32 1.0, %v1098_v42 }
 0x147   : > { %v1100_v46 = vpop.eup %1099  ;;  %1103 = vpow2.f32 %v1034_v43  ;;  %v1035_v47 = vmul.f32 -1.442695, %v488_v44 }
 0x148   : > { %v1102_v48 = vpop.eup %1101  ;;  %1105 = vrcp.f32 %v580_v45  ;;  %v1352_v50 = vadd.f32 1.0, %v1100_v46  ;;  %v619_v9 = vand.u32 2147483647, %v580_v45  ;;  %v621_v10 = vand.u32 2147483648, %v580_v45 }
 0x149   : > { %v596_v49 = vmul.f32 %v1102_v48, %v579_v38  ;;  %1107 = vpow2.f32 %v1035_v47  ;;  %vm601_vm0 = vweird.f32 %v1102_v48  ;;  %vm615_vm5 = vweird.f32 %v580_v45 }
 0x14a   : > { %v516_v51 = vpop.f32.mrf.mxu2  ;;  %1109 = vrcp.f32 %v1352_v50  ;;  %vm602_vm2 = vmor %vm600_vm1, %vm601_vm0  ;;  %v634_v15 = vand.u32 2147483647, %v1352_v50  ;;  %v636_v18 = vand.u32 2147483648, %v1352_v50  ;;  %vm620_vm7 = vcmp.eq.f32.partialorder %v619_v9, 8.507059e+37 }
 0x14b   : > { %v597_v52 = vsub.f32 1.0, %v596_v49  ;;  %v517_v55 = vadd.f32 %v516_v51, %v1346_v30  ;;  %v622_v22 = vor.u32 1.1754944e-38, %v621_v10  ;;  %vm630_vm9 = vweird.f32 %v1352_v50 }
 0x14c   : > { %v489_v56 = vpop.f32.mrf.mxu1  ;;  %vm635_vm11 = vcmp.eq.f32.partialorder %v634_v15, 8.507059e+37  ;;  %v637_v35 = vor.u32 1.1754944e-38, %v636_v18 }
 0x14d   : > { %v1104_v57 = vpop.eup %1103  ;;  %v598_v58 = vmul.f32 %v1102_v48, %v597_v52  ;;  %v490_v59 = vadd.f32 %v489_v56, %v1343_v26  ;;  %v1036_v62 = vmul.f32 -1.442695, %v517_v55 }
 0x14e   : > { %v1106_v60 = vpop.eup %1105  ;;  %v1358_v61 = vadd.f32 1.0, %v1104_v57 }
 0x14f   : > { %v1108_v63 = vpop.eup %1107  ;;  %v599_v0 = vadd.f32 %v1102_v48, %v598_v58  ;;  %v611_v1 = vmul.f32 %v1106_v60, %v580_v45  ;;  %v1037_v3 = vmul.f32 -1.442695, %v490_v59  ;;  %vm616_vm4 = vweird.f32 %v1106_v60 }
 0x150   : > { %1111 = vrcp.f32 %v1358_v61  ;;  %v1110_v4 = vpop.eup %1109  ;;  %v1366_v7 = vadd.f32 1.0, %v1108_v63  ;;  %vm617_vm6 = vmor %vm615_vm5, %vm616_vm4  ;;  %v651_v39 = vand.u32 2147483648, %v1358_v61  ;;  %v649_v44 = vand.u32 2147483647, %v1358_v61 }
 0x151   : > { %v603_v5 = vsel %vm602_vm2, %v1102_v48, %v599_v0  ;;  %v612_v6 = vsub.f32 1.0, %v611_v1  ;;  %1113 = vpow2.f32 %v1036_v62  ;;  %v626_v11 = vmul.f32 %v1110_v4, %v1352_v50 }
 0x152   : > { %v608_v8 = vsel %vm605_vm3, %v607_v2, %v603_v5  ;;  %v518_v12 = vpop.f32.mrf.mxu2  ;;  %1115 = vrcp.f32 %v1366_v7  ;;  %vm631_vm8 = vweird.f32 %v1110_v4  ;;  %vm645_vm13 = vweird.f32 %v1358_v61 }
 0x153   : > { %835 = vst [vmem:[%s1363_s20] sm:$0xff] %v608_v8  ;;  %v613_v13 = vmul.f32 %v1106_v60, %v612_v6  ;;  %v627_v14 = vsub.f32 1.0, %v626_v11  ;;  %1117 = vpow2.f32 %v1037_v3  ;;  %v519_v19 = vadd.f32 %v518_v12, %v1346_v30  ;;  %vm632_vm10 = vmor %vm630_vm9, %vm631_vm8 }
 0x154   : > { %v492_v16 = vpop.f32.mrf.mxu1  ;;  %v664_v49 = vand.u32 2147483647, %v1366_v7  ;;  %v666_v50 = vand.u32 2147483648, %v1366_v7  ;;  %v652_v52 = vor.u32 1.1754944e-38, %v651_v39  ;;  %vm650_vm0 = vcmp.eq.f32.partialorder %v649_v44, 8.507059e+37 }
 0x155   : > { %v614_v17 = vadd.f32 %v1106_v60, %v613_v13  ;;  %v493_v20 = vadd.f32 %v492_v16, %v1343_v26  ;;  %v628_v23 = vmul.f32 %v1110_v4, %v627_v14  ;;  %v1038_v28 = vmul.f32 -1.442695, %v519_v19 }
 0x156   : > { %v1112_v21 = vpop.eup %1111  ;;  %vm660_vm1 = vweird.f32 %v1366_v7  ;;  %vm665_vm3 = vcmp.eq.f32.partialorder %v664_v49, 8.507059e+37  ;;  %v667_v62 = vor.u32 1.1754944e-38, %v666_v50 }
 0x157   : > { %v1114_v24 = vpop.eup %1113  ;;  %v618_v25 = vsel %vm617_vm6, %v1106_v60, %v614_v17  ;;  %v641_v27 = vmul.f32 %v1112_v21, %v1358_v61  ;;  %v629_v31 = vadd.f32 %v1110_v4, %v628_v23  ;;  %v1039_v33 = vmul.f32 -1.442695, %v493_v20 }
 0x158   : > { %v623_v29 = vsel %vm620_vm7, %v622_v22, %v618_v25  ;;  %v1377_v32 = vadd.f32 1.0, %v1114_v24  ;;  %v1116_v34 = vpop.eup %1115  ;;  %1119 = vpow2.f32 %v1038_v28  ;;  %vm646_vm12 = vweird.f32 %v1112_v21 }
 0x159   : > { %836 = vst [vmem:[%s1363_s20 + $0x8] sm:$0xff] %v623_v29  ;;  %v642_v36 = vsub.f32 1.0, %v641_v27  ;;  %v1118_v37 = vpop.eup %1117  ;;  %v633_v38 = vsel %vm632_vm10, %v1110_v4, %v629_v31  ;;  %v656_v40 = vmul.f32 %v1116_v34, %v1366_v7  ;;  %vm647_vm14 = vmor %vm645_vm13, %vm646_vm12  ;;  %vm661_vm15 = vweird.f32 %v1116_v34 }
 0x15a   : > { %1121 = vrcp.f32 %v1377_v32  ;;  %v521_v41 = vpop.f32.mrf.mxu2  ;;  %v638_v42 = vsel %vm635_vm11, %v637_v35, %v633_v38  ;;  %v1386_v46 = vadd.f32 1.0, %v1118_v37  ;;  %vm662_vm2 = vmor %vm660_vm1, %vm661_vm15  ;;  %v679_v2 = vand.u32 2147483647, %v1377_v32 }
 0x15b   : > { %v643_v43 = vmul.f32 %v1112_v21, %v642_v36  ;;  %837 = vst [vmem:[%s1363_s20 + $0x10] sm:$0xff] %v638_v42  ;;  %v657_v45 = vsub.f32 1.0, %v656_v40  ;;  %1123 = vpow2.f32 %v1039_v33  ;;  %v522_v51 = vadd.f32 %v521_v41, %v1346_v30 }
 0x15c   : > { %v494_v47 = vpop.f32.mrf.mxu1  ;;  %1125 = vrcp.f32 %v1386_v46  ;;  %v681_v3 = vand.u32 2147483648, %v1377_v32  ;;  %vm675_vm5 = vweird.f32 %v1377_v32  ;;  %vm1407_vm6 = vcmp.eq.f32.partialorder %v679_v2, 8.507059e+37 }
 0x15d   : > { %v644_v48 = vadd.f32 %v1112_v21, %v643_v43  ;;  %v658_v53 = vmul.f32 %v1116_v34, %v657_v45  ;;  %v495_v56 = vadd.f32 %v494_v47, %v1343_v26  ;;  %v1040_v61 = vmul.f32 -1.442695, %v522_v51 }
 0x15e   : > { %v1120_v54 = vpop.eup %1119  ;;  %v682_v15 = vor.u32 1.1754944e-38, %v681_v3  ;;  %vm690_vm8 = vweird.f32 %v1386_v46  ;;  %v694_v20 = vand.u32 2147483647, %v1386_v46 }
 0x15f   : > { %v648_v55 = vsel %vm647_vm14, %v1112_v21, %v644_v48  ;;  %v659_v59 = vadd.f32 %v1116_v34, %v658_v53  ;;  %v1394_v60 = vadd.f32 1.0, %v1120_v54  ;;  %v1041_v8 = vmul.f32 -1.442695, %v495_v56 }
 0x160   : > { %v1122_v57 = vpop.eup %1121  ;;  %v653_v58 = vsel %vm650_vm0, %v652_v52, %v648_v55  ;;  %v696_v21 = vand.u32 2147483648, %v1386_v46  ;;  %vm695_vm11 = vcmp.eq.f32.partialorder %v694_v20, 8.507059e+37 }
 0x161   : > { %838 = vst [vmem:[%s1363_s20 + $0x18] sm:$0xff] %v653_v58  ;;  %v671_v63 = vmul.f32 %v1122_v57, %v1377_v32  ;;  %v1124_v0 = vpop.eup %1123  ;;  %v663_v1 = vsel %vm662_vm2, %v1116_v34, %v659_v59  ;;  %1127 = vrcp.f32 %v1394_v60  ;;  %vm676_vm4 = vweird.f32 %v1122_v57 }
 0x162   : > { %v523_v4 = vpop.f32.mrf.mxu2  ;;  %v668_v5 = vsel %vm665_vm3, %v667_v62, %v663_v1  ;;  %v1401_v7 = vadd.f32 1.0, %v1124_v0  ;;  %v1126_v9 = vpop.eup %1125  ;;  %1129 = vpow2.f32 %v1040_v61  ;;  %vm677_vm7 = vmor %vm675_vm5, %vm676_vm4  ;;  %v709_v29 = vand.u32 2147483647, %v1394_v60 }
 0x163   : > { %v672_v6 = vsub.f32 1.0, %v671_v63  ;;  %839 = vst [vmem:[%s1363_s20 + $0x20] sm:$0xff] %v668_v5  ;;  %v524_v10 = vadd.f32 %v523_v4, %v1346_v30  ;;  %v686_v13 = vmul.f32 %v1126_v9, %v1386_v46  ;;  %vm691_vm9 = vweird.f32 %v1126_v9 }
 0x164   : > { %v497_v11 = vpop.f32.mrf.mxu1  ;;  %1131 = vrcp.f32 %v1401_v7  ;;  %v711_v35 = vand.u32 2147483648, %v1394_v60  ;;  %vm692_vm10 = vmor %vm690_vm8, %vm691_vm9  ;;  %v697_v38 = vor.u32 1.1754944e-38, %v696_v21  ;;  %vm705_vm13 = vweird.f32 %v1394_v60 }
 0x165   : > { %v673_v12 = vmul.f32 %v1122_v57, %v672_v6  ;;  %v687_v17 = vsub.f32 1.0, %v686_v13  ;;  %1133 = vpow2.f32 %v1041_v8  ;;  %v1042_v18 = vmul.f32 -1.442695, %v524_v10 }
 0x166   : > { %v498_v22 = vadd.f32 %v497_v11, %v1343_v26  ;;  %vm1429_vm14 = vcmp.eq.f32.partialorder %v709_v29, 8.507059e+37  ;;  %v712_v48 = vor.u32 1.1754944e-38, %v711_v35  ;;  %v724_v52 = vand.u32 2147483647, %v1401_v7 }
 0x167   : > { %v674_v16 = vadd.f32 %v1122_v57, %v673_v12  ;;  %v1128_v19 = vpop.eup %1127  ;;  %v688_v24 = vmul.f32 %v1126_v9, %v687_v17  ;;  %1135 = vpow2.f32 %v1042_v18  ;;  %v726_v53 = vand.u32 2147483648, %v1401_v7 }
 0x168   : > { %v701_v25 = vmul.f32 %v1128_v19, %v1394_v60  ;;  %v1130_v27 = vpop.eup %1129  ;;  %v1043_v31 = vmul.f32 -1.442695, %v498_v22  ;;  %vm706_vm12 = vweird.f32 %v1128_v19  ;;  %vm720_vm1 = vweird.f32 %v1401_v7 }
 0x169   : > { %v678_v23 = vsel %vm677_vm7, %v1122_v57, %v674_v16  ;;  %v689_v33 = vadd.f32 %v1126_v9, %v688_v24  ;;  %v1422_v36 = vadd.f32 1.0, %v1130_v27  ;;  %vm707_vm15 = vmor %vm705_vm13, %vm706_vm12  ;;  %vm725_vm3 = vcmp.eq.f32.partialorder %v724_v52, 8.507059e+37 }
 0x16a   : > { %v683_v28 = vsel %vm1407_vm6, %v682_v15, %v678_v23  ;;  %v526_v32 = vpop.f32.mrf.mxu2  ;;  %v702_v34 = vsub.f32 1.0, %v701_v25  ;;  %v1132_v37 = vpop.eup %1131  ;;  %1137 = vpow2.f32 %v1043_v31  ;;  %v727_v0 = vor.u32 1.1754944e-38, %v726_v53 }
 0x16b   : > { %840 = vst [vmem:[%s1363_s20 + $0x28] sm:$0xff] %v683_v28  ;;  %v527_v39 = vadd.f32 %v526_v32, %v1346_v30  ;;  %v1134_v40 = vpop.eup %1133  ;;  %v693_v41 = vsel %vm692_vm10, %v1126_v9, %v689_v33  ;;  %v716_v43 = vmul.f32 %v1132_v37, %v1401_v7  ;;  %1139 = vrcp.f32 %v1422_v36 }
 0x16c   : > { %v703_v42 = vmul.f32 %v1128_v19, %v702_v34  ;;  %v698_v44 = vsel %vm695_vm11, %v697_v38, %v693_v41  ;;  %v499_v46 = vpop.f32.mrf.mxu1  ;;  %v1435_v50 = vadd.f32 1.0, %v1134_v40  ;;  %vm721_vm0 = vweird.f32 %v1132_v37 }
 0x16d   : > { %841 = vst [vmem:[%s1363_s20 + $0x30] sm:$0xff] %v698_v44  ;;  %v717_v49 = vsub.f32 1.0, %v716_v43  ;;  %v1136_v51 = vpop.eup %1135  ;;  %v1044_v54 = vmul.f32 -1.442695, %v527_v39  ;;  %v500_v57 = vadd.f32 %v499_v46, %v1343_v26  ;;  %vm722_vm2 = vmor %vm720_vm1, %vm721_vm0  ;;  %v739_v5 = vand.u32 2147483647, %v1422_v36 }
 0x16e   : > { %v704_v47 = vadd.f32 %v1128_v19, %v703_v42  ;;  %1141 = vrcp.f32 %v1435_v50  ;;  %v1445_v61 = vadd.f32 1.0, %v1136_v51  ;;  %v741_v8 = vand.u32 2147483648, %v1422_v36 }
 0x16f   : > { %v718_v56 = vmul.f32 %v1132_v37, %v717_v49  ;;  %1143 = vpow2.f32 %v1044_v54  ;;  %v1045_v3 = vmul.f32 -1.442695, %v500_v57  ;;  %v754_v11 = vand.u32 2147483647, %v1435_v50 }
 0x170   : > { %v708_v55 = vsel %vm707_vm15, %v1128_v19, %v704_v47  ;;  %v1138_v58 = vpop.eup %1137  ;;  %1145 = vrcp.f32 %v1445_v61  ;;  %v756_v14 = vand.u32 2147483648, %v1435_v50  ;;  %vm735_vm5 = vweird.f32 %v1422_v36 }
 0x171   : > { %v713_v59 = vsel %vm1429_vm14, %v712_v48, %v708_v55  ;;  %v719_v60 = vadd.f32 %v1132_v37, %v718_v56  ;;  %v1447_v62 = vadd.f32 1.0, %v1138_v58  ;;  %v1140_v63 = vpop.eup %1139  ;;  %vm740_vm6 = vcmp.eq.f32.partialorder %v739_v5, 8.507059e+37 }
 0x172   : > { %842 = vst [vmem:[%s1363_s20 + $0x38] sm:$0xff] %v713_v59  ;;  %v528_v26 = vpop.f32.mrf.mxu2  ;;  %v731_v2 = vmul.f32 %v1140_v63, %v1422_v36  ;;  %vm736_vm4 = vweird.f32 %v1140_v63  ;;  %v742_v19 = vor.u32 1.1754944e-38, %v741_v8  ;;  %vm750_vm9 = vweird.f32 %v1435_v50 }
 0x173   : > { %v723_v1 = vsel %vm722_vm2, %v1132_v37, %v719_v60  ;;  %1147 = vrcp.f32 %v1447_v62  ;;  %v529_v9 = vadd.f32 %v528_v26, %v1346_v30  ;;  %vm737_vm7 = vmor %vm735_vm5, %vm736_vm4  ;;  %vm1466_vm10 = vcmp.eq.f32.partialorder %v754_v11, 8.507059e+37 }
 0x174   : > { %v728_v4 = vsel %vm725_vm3, %v727_v0, %v723_v1  ;;  %v1142_v6 = vpop.eup %1141  ;;  %v732_v7 = vsub.f32 1.0, %v731_v2  ;;  %1149 = vpow2.f32 %v1045_v3  ;;  %v757_v25 = vor.u32 1.1754944e-38, %v756_v14 }
 0x175   : > { %843 = vst [vmem:[%s1363_s20 + $0x40] sm:$0xff] %v728_v4  ;;  %v746_v10 = vmul.f32 %v1142_v6, %v1435_v50  ;;  %v1144_v12 = vpop.eup %1143  ;;  %v1046_v30 = vmul.f32 -1.442695, %v529_v9  ;;  %vm751_vm8 = vweird.f32 %v1142_v6  ;;  %v769_v33 = vand.u32 2147483647, %v1445_v61 }
 0x176   : > { %v733_v13 = vmul.f32 %v1140_v63, %v732_v7  ;;  %v1461_v16 = vadd.f32 1.0, %v1144_v12  ;;  %v1146_v17 = vpop.eup %1145  ;;  %vm752_vm11 = vmor %vm750_vm9, %vm751_vm8  ;;  %v771_v34 = vand.u32 2147483648, %v1445_v61  ;;  %vm765_vm13 = vweird.f32 %v1445_v61 }
 0x177   : > { %v747_v15 = vsub.f32 1.0, %v746_v10  ;;  %v761_v21 = vmul.f32 %v1146_v17, %v1445_v61  ;;  %vm766_vm12 = vweird.f32 %v1146_v17  ;;  %v784_v40 = vand.u32 2147483647, %v1447_v62 }
 0x178   : > { %v734_v18 = vadd.f32 %v1140_v63, %v733_v13  ;;  %1151 = vrcp.f32 %v1461_v16  ;;  %v786_v41 = vand.u32 2147483648, %v1447_v62  ;;  %vm767_vm15 = vmor %vm765_vm13, %vm766_vm12  ;;  %v772_v45 = vor.u32 1.1754944e-38, %v771_v34 }
 0x179   : > { %v748_v20 = vmul.f32 %v1142_v6, %v747_v15  ;;  %v1148_v22 = vpop.eup %1147  ;;  %v762_v29 = vsub.f32 1.0, %v761_v21  ;;  %1153 = vpow2.f32 %v1046_v30  ;;  %vm770_vm0 = vcmp.eq.f32.partialorder %v769_v33, 8.507059e+37 }
 0x17a   : > { %v738_v23 = vsel %vm737_vm7, %v1140_v63, %v734_v18  ;;  %v776_v31 = vmul.f32 %v1148_v22, %v1447_v62  ;;  %v1150_v32 = vpop.eup %1149  ;;  %vm781_vm14 = vweird.f32 %v1148_v22  ;;  %vm780_vm1 = vweird.f32 %v1447_v62 }
 0x17b   : > { %v743_v27 = vsel %vm740_vm6, %v742_v19, %v738_v23  ;;  %v749_v28 = vadd.f32 %v1142_v6, %v748_v20  ;;  %v763_v36 = vmul.f32 %v1146_v17, %v762_v29  ;;  %v593_v38 = vadd.f32 1.0, %v1150_v32  ;;  %vm782_vm2 = vmor %vm780_vm1, %vm781_vm14 }
 0x17c   : > { %844 = vst [vmem:[%s1363_s20 + $0x48] sm:$0xff] %v743_v27  ;;  %v777_v37 = vsub.f32 1.0, %v776_v31  ;;  %v787_v51 = vor.u32 1.1754944e-38, %v786_v41  ;;  %vm785_vm3 = vcmp.eq.f32.partialorder %v784_v40, 8.507059e+37  ;;  %v801_v54 = vand.u32 2147483648, %v1461_v16 }
 0x17d   : > { %v753_v35 = vsel %vm752_vm11, %v1142_v6, %v749_v28  ;;  %v764_v43 = vadd.f32 %v1146_v17, %v763_v36  ;;  %1155 = vrcp.f32 %v593_v38  ;;  %v799_v58 = vand.u32 2147483647, %v1461_v16 }
 0x17e   : > { %v758_v39 = vsel %vm1466_vm10, %v757_v25, %v753_v35  ;;  %v1152_v42 = vpop.eup %1151  ;;  %v778_v44 = vmul.f32 %v1148_v22, %v777_v37  ;;  %vm795_vm5 = vweird.f32 %v1461_v16  ;;  %v802_v62 = vor.u32 1.1754944e-38, %v801_v54 }
 0x17f   : > { %845 = vst [vmem:[%s1363_s20 + $0x50] sm:$0xff] %v758_v39  ;;  %v791_v46 = vmul.f32 %v1152_v42, %v1461_v16  ;;  %v768_v47 = vsel %vm767_vm15, %v1146_v17, %v764_v43  ;;  %v1154_v49 = vpop.eup %1153  ;;  %vm796_vm4 = vweird.f32 %v1152_v42  ;;  %vm800_vm7 = vcmp.eq.f32.partialorder %v799_v58, 8.507059e+37 }
 0x180   : > { %v779_v48 = vadd.f32 %v1148_v22, %v778_v44  ;;  %v773_v50 = vsel %vm770_vm0, %v772_v45, %v768_v47  ;;  %v594_v55 = vadd.f32 1.0, %v1154_v49  ;;  %vm797_vm6 = vmor %vm795_vm5, %vm796_vm4  ;;  %v816_v1 = vand.u32 2147483648, %v593_v38 }
 0x181   : > { %v792_v52 = vsub.f32 1.0, %v791_v46  ;;  %846 = vst [vmem:[%s1363_s20 + $0x58] sm:$0xff] %v773_v50  ;;  %v814_v3 = vand.u32 2147483647, %v593_v38  ;;  %vm810_vm9 = vweird.f32 %v593_v38 }
 0x182   : > { %v783_v53 = vsel %vm782_vm2, %v1148_v22, %v779_v48  ;;  %1157 = vrcp.f32 %v594_v55  ;;  %v817_v7 = vor.u32 1.1754944e-38, %v816_v1  ;;  %v831_v11 = vand.u32 2147483648, %v594_v55 }
 0x183   : > { %v788_v56 = vsel %vm785_vm3, %v787_v51, %v783_v53  ;;  %v793_v57 = vmul.f32 %v1152_v42, %v792_v52  ;;  %v1156_v59 = vpop.eup %1155  ;;  %vm815_vm11 = vcmp.eq.f32.partialorder %v814_v3, 8.507059e+37  ;;  %v829_v13 = vand.u32 2147483647, %v594_v55 }
 0x184   : > { %847 = vst [vmem:[%s1363_s20 + $0x60] sm:$0xff] %v788_v56  ;;  %v806_v61 = vmul.f32 %v1156_v59, %v593_v38  ;;  %vm811_vm8 = vweird.f32 %v1156_v59  ;;  %vm825_vm13 = vweird.f32 %v594_v55  ;;  %v832_v15 = vor.u32 1.1754944e-38, %v831_v11 }
 0x185   : > { %v794_v60 = vadd.f32 %v1152_v42, %v793_v57  ;;  %vm812_vm10 = vmor %vm810_vm9, %vm811_vm8  ;;  %vm830_vm15 = vcmp.eq.f32.partialorder %v829_v13, 8.507059e+37 }
 0x186   : > { %v807_v0 = vsub.f32 1.0, %v806_v61 }
 0x187   : > { %v798_v63 = vsel %vm797_vm6, %v1152_v42, %v794_v60 }
 0x188   : > { %v803_v26 = vsel %vm800_vm7, %v802_v62, %v798_v63  ;;  %v808_v2 = vmul.f32 %v1156_v59, %v807_v0  ;;  %v1158_v4 = vpop.eup %1157 }
 0x189   : > { %848 = vst [vmem:[%s1363_s20 + $0x68] sm:$0xff] %v803_v26  ;;  %v821_v6 = vmul.f32 %v1158_v4, %v594_v55  ;;  %vm826_vm12 = vweird.f32 %v1158_v4 }
 0x18a   : > { %v809_v5 = vadd.f32 %v1156_v59, %v808_v2  ;;  %vm827_vm14 = vmor %vm825_vm13, %vm826_vm12 }
 0x18b   : > { %v822_v9 = vsub.f32 1.0, %v821_v6 }
 0x18c   : > { %v813_v8 = vsel %vm812_vm10, %v1156_v59, %v809_v5 }
 0x18d   : > { %v818_v10 = vsel %vm815_vm11, %v817_v7, %v813_v8  ;;  %v823_v12 = vmul.f32 %v1158_v4, %v822_v9 }
 0x18e   : > { %849 = vst [vmem:[%s1363_s20 + $0x70] sm:$0xff] %v818_v10 }
 0x18f   : > { %v824_v14 = vadd.f32 %v1158_v4, %v823_v12 }
 0x191   : > { %v828_v16 = vsel %vm827_vm14, %v1158_v4, %v824_v14 }
 0x192   : > { %v833_v17 = vsel %vm830_vm15, %v832_v15, %v828_v16 }
 0x193   : > { %850 = vst [vmem:[%s1363_s20 + $0x78] sm:$0xff] %v833_v17 }
 0x194 PF: > { %s15_s18 = sadd.s32 1, %s1165_s18  }
 0x195   : > { %p12_p4 = scmp.ge.s32.totalorder %s15_s18, 4  }
 0x197   :  { %14 = sbr.rel (!%p12_p4) target bundleno = 1 (0x1), region = 70 }

</bundles_post_ra>
